<compile_context>
chip_gen: v7x
topology: tpu7x:2x2x1
jax: 0.10.0
libtpu: 0.0.40
codegen_flags: <defaults>
</compile_context>

<pallas_src>
import jax
import jax.numpy as jnp
from jax.experimental import pallas as pl
from jax.experimental.pallas import tpu as pltpu

_LANE = 128
_STEP_DATA_BUDGET = 6 << 20      # double-buffered per-step input/output bytes
_MAX_TILE_HW = 32768             # spatial-lane cap per review (16K-32K)
_MAX_BATCH_BLOCK = 8             # bound the unrolled per-step batch loop
_VMEM_LIMIT = 32 << 20           # explicit, safe on v5e/v6e/v7x


def _pick_tile_hw(hw, max_tile):
    """Largest tile <= max_tile dividing hw; prefer lane-aligned tiles."""
    if hw <= max_tile:
        return hw
    t = (max_tile // _LANE) * _LANE
    while t >= _LANE:
        if hw % t == 0:
            return t
        t -= _LANE
    # No lane-aligned divisor under the cap: fall back to the largest plain
    # divisor <= max_tile (masked stores, but bounded VMEM footprint — never
    # "whole HW as one block").
    for t in range(max_tile, 0, -1):
        if hw % t == 0:
            return t
    return hw


def _choose_tiling(n, cin, cout, hw, itemsize,
                   budget_bytes=_STEP_DATA_BUDGET, max_tile=_MAX_TILE_HW):
    """Pick (batch_block, spatial_tile) so the double-buffered per-step data
    footprint (x + out/targets) stays under budget_bytes."""
    per_lane = (cin + cout) * itemsize * 2          # x + (out|targets), 2 bufs
    cap = max(_LANE, min(max_tile, (budget_bytes // per_lane) // _LANE * _LANE))
    tile_hw = _pick_tile_hw(hw, cap)
    per_image = per_lane * tile_hw
    nb = int(max(1, min(n, _MAX_BATCH_BLOCK, budget_bytes // max(per_image, 1))))
    while n % nb:
        nb -= 1
    return nb, tile_hw


# ---------------------------------------------------------------------------
# Kernel 1 (inference path): 1x1 conv + ReLU, channels-first, batch-blocked.
#   x block : (nb, Cin, T)   w: (Cout, Cin) [compute dtype]   b: (Cout, 1) f32
#   out blk : (nb, Cout, T)  -> lane-dense stores (T multiple of 128)
# ---------------------------------------------------------------------------
def _conv1x1_relu_kernel(x_ref, w_ref, b_ref, o_ref):
    w = w_ref[...]
    b = b_ref[...]
    for i in range(x_ref.shape[0]):          # static batch block, unrolled
        y = jnp.dot(w, x_ref[i], preferred_element_type=jnp.float32)
        o_ref[i] = jnp.maximum(y + b, 0.0).astype(o_ref.dtype)


def conv1x1_relu_pallas(x_flat, weight, bias_col):
    """x_flat: (N, Cin, HW) -> (N, Cout, HW), same dtype as x_flat."""
    N, Cin, HW = x_flat.shape
    Cout = weight.shape[0]
    weight = weight.astype(x_flat.dtype)     # tiny (Cout,Cin) cast, MXU-native
    nb, tile_hw = _choose_tiling(N, Cin, Cout, HW, x_flat.dtype.itemsize)
    grid = (N // nb, HW // tile_hw)
    return pl.pallas_call(
        _conv1x1_relu_kernel,
        out_shape=jax.ShapeDtypeStruct((N, Cout, HW), x_flat.dtype),
        grid_spec=pltpu.PrefetchScalarGridSpec(
            num_scalar_prefetch=0,
            grid=grid,
            in_specs=[
                pl.BlockSpec((nb, Cin, tile_hw), lambda n, t: (n, 0, t)),
                pl.BlockSpec((Cout, Cin), lambda n, t: (0, 0)),
                pl.BlockSpec((Cout, 1), lambda n, t: (0, 0)),
            ],
            out_specs=pl.BlockSpec((nb, Cout, tile_hw), lambda n, t: (n, 0, t)),
        ),
        compiler_params=pltpu.CompilerParams(
            dimension_semantics=("parallel", "parallel"),
            vmem_limit_bytes=_VMEM_LIMIT),
    )(x_flat, weight, bias_col)


# ---------------------------------------------------------------------------
# Kernel 2 (training path): fused 1x1 conv + ReLU + weighted-MSE reduction.
# Per spatial tile (for each image in the batch block):
#   y = relu(W @ x + b);  acc += tw * (y - target)^2     (lane-dense, VPU only)
# At the last spatial tile the (Cout, T) accumulator is reduced once to a
# per-batch-block partial loss.  Output indexed by the batch axis -> batch
# axis can be "parallel" (megacore on v7x) without racing an accumulator.
# ---------------------------------------------------------------------------
def _fused_loss_kernel(x_ref, w_ref, b_ref, t_ref, tw_ref, loss_ref, acc_ref):
    s = pl.program_id(1)

    @pl.when(s == 0)
    def _():
        acc_ref[...] = jnp.zeros_like(acc_ref)

    w = w_ref[...]
    b = b_ref[...]
    for i in range(x_ref.shape[0]):          # static batch block, unrolled
        y = jnp.dot(w, x_ref[i], preferred_element_type=jnp.float32)
        y = jnp.maximum(y + b, 0.0)
        d = y - t_ref[i].astype(jnp.float32)
        acc_ref[...] += tw_ref[i] * (d * d)  # elementwise f32 accumulate

    @pl.when(s == pl.num_programs(1) - 1)
    def _():
        # single cross-lane reduce per batch block
        loss_ref[...] = jnp.sum(acc_ref[...]).reshape(1, 1)


def fused_train_loss_pallas(x_flat, weight, bias_col, targets_flat, tw_col):
    N, Cin, HW = x_flat.shape
    Cout = weight.shape[0]
    weight = weight.astype(x_flat.dtype)
    nb, tile_hw = _choose_tiling(N, Cin, Cout, HW, x_flat.dtype.itemsize)
    n_bblocks = N // nb
    grid = (n_bblocks, HW // tile_hw)

    partials = pl.pallas_call(
        _fused_loss_kernel,
        out_shape=jax.ShapeDtypeStruct((n_bblocks, 1, 1), jnp.float32),
        grid_spec=pltpu.PrefetchScalarGridSpec(
            num_scalar_prefetch=0,
            grid=grid,
            in_specs=[
                pl.BlockSpec((nb, Cin, tile_hw), lambda n, t: (n, 0, t)),
                pl.BlockSpec((Cout, Cin), lambda n, t: (0, 0)),
                pl.BlockSpec((Cout, 1), lambda n, t: (0, 0)),
                pl.BlockSpec((nb, Cout, tile_hw), lambda n, t: (n, 0, t)),
                pl.BlockSpec((nb, Cout, 1), lambda n, t: (n, 0, 0)),
            ],
            out_specs=pl.BlockSpec((None, 1, 1), lambda n, t: (n, 0, 0)),
            scratch_shapes=[pltpu.VMEM((Cout, tile_hw), jnp.float32)],
        ),
        compiler_params=pltpu.CompilerParams(
            # batch axis: independent partial outputs -> megacore-safe parallel
            # spatial axis: running reduction in acc_ref -> arbitrary
            dimension_semantics=("parallel", "arbitrary"),
            vmem_limit_bytes=_VMEM_LIMIT),
    )(x_flat, weight, bias_col, targets_flat, tw_col)

    inv_denom = 1.0 / float(N * Cout * HW)
    return jnp.sum(partials) * inv_denom


# ---------------------------------------------------------------------------
# Estimator (mirrors BaseEstimator.forward dispatch semantics)
# ---------------------------------------------------------------------------
class BaseEstimatorPallas:
    def __init__(self, in_channels, out_channels, key,
                 compute_dtype=jnp.bfloat16):
        k_w, k_b = jax.random.split(key)
        # deterministic synthetic 1x1-conv parameters, channels-first layout
        self.weight = jax.random.normal(
            k_w, (out_channels, in_channels), jnp.float32) * 0.1   # (Cout,Cin)
        self.bias = (jax.random.normal(k_b, (out_channels, 1), jnp.float32)
                     * 0.01)                                       # (Cout,1)
        # bf16 activations/targets/heatmaps; f32 MXU accumulate + f32 loss acc
        self.compute_dtype = compute_dtype
        self.neck = None

    @property
    def with_neck(self):
        return self.neck is not None

    def init_weights(self, pretrained=None):
        # TODO(synk): base class only logs when `pretrained` is set; no
        # checkpoint loading in this synthetic kernel.
        pass

    def extract_feat(self, image):
        # image: NCHW.  Pure reshape + dtype cast only (no transposes).
        N, C, H, W = image.shape
        x_flat = image.astype(self.compute_dtype).reshape(N, C, H * W)
        y_flat = conv1x1_relu_pallas(x_flat, self.weight, self.bias)
        return y_flat.reshape(N, self.weight.shape[0], H, W)

    def extract_feats(self, imgs):
        assert isinstance(imgs, list)
        for img in imgs:
            yield self.extract_feat(img)

    def forward_train(self, image, meta, targets, target_weights, **kwargs):
        # TODO(synk): forward_train is abstract in BaseEstimator; this is a
        # minimal concrete realization (weighted MSE heatmap loss), fused with
        # feature extraction to avoid an HBM round-trip of the activations.
        N, Cin, H, W = image.shape
        Cout = self.weight.shape[0]
        x_flat = image.astype(self.compute_dtype).reshape(N, Cin, H * W)
        tgt_flat = targets.astype(self.compute_dtype).reshape(N, Cout, H * W)
        tw_col = target_weights.reshape(N, Cout, 1).astype(jnp.float32)
        loss = fused_train_loss_pallas(x_flat, self.weight, self.bias,
                                       tgt_flat, tw_col)
        return {"loss": loss}

    def forward_test(self, image, **kwargs):
        # TODO(synk): base forward_test is `pass` (returns None); we return
        # the extracted heatmaps for a usable test path.
        return self.extract_feat(image)

    def simple_test(self, input, meta, **kwargs):
        return self.forward_test(input, **kwargs)

    def aug_test(self, input, meta, **kwargs):
        return self.forward_test(input, **kwargs)

    def forward(self, image, meta=None, targets=None, target_weights=None,
                return_loss=True, **kwargs):
        if return_loss:
            return self.forward_train(image, meta, targets, target_weights,
                                      **kwargs)
        else:
            return self.forward_test(image, **kwargs)


if __name__ == "__main__":
    key = jax.random.PRNGKey(0)
    k_img, k_tgt, k_w, k_model = jax.random.split(key, 4)

    N, Cin, H, W = 2, 4, 16, 16
    Cout = 8

    image = jax.random.normal(k_img, (N, Cin, H, W), jnp.float32)
    targets = jax.random.normal(k_tgt, (N, Cout, H, W), jnp.float32)
    target_weights = jax.random.uniform(k_w, (N, Cout), jnp.float32)

    model = BaseEstimatorPallas(Cin, Cout, k_model)

    # training path (return_loss=True) — fused conv + weighted-MSE kernel
    out_train = model.forward(image, meta=None, targets=targets,
                              target_weights=target_weights, return_loss=True)
    jax.block_until_ready(out_train["loss"])

    # inference path (return_loss=False) — tiled conv kernel
    out_test = model.forward(image, return_loss=False)
    jax.block_until_ready(out_test)

    assert out_test.shape == (N, Cout, H, W)
    assert out_test.dtype == model.compute_dtype
    assert out_train["loss"].shape == ()

    # pure-JAX reference mirroring the kernels' dtype semantics (bf16 operands,
    # f32 math), independent of the Pallas outputs.
    cd = model.compute_dtype
    x_c = image.astype(cd).astype(jnp.float32).reshape(N, Cin, H * W)
    w_c = model.weight.astype(cd).astype(jnp.float32)
    y_ref = jnp.einsum("oc,bcs->bos", w_c, x_c)
    y_ref = jnp.maximum(y_ref + model.bias[None], 0.0)        # (N, Cout, HW) f32

    ref_test = y_ref.astype(cd).reshape(N, Cout, H, W)
    assert jnp.allclose(out_test.astype(jnp.float32),
                        ref_test.astype(jnp.float32), rtol=2e-2, atol=2e-2)

    tgt_c = targets.astype(cd).astype(jnp.float32).reshape(N, Cout, H * W)
    d = y_ref - tgt_c
    ref_loss = jnp.sum(target_weights[:, :, None] * d * d) / float(
        N * Cout * H * W)
    assert jnp.allclose(out_train["loss"], ref_loss, rtol=1e-3, atol=1e-5)

    print("KERNEL_OK")
</pallas_src>

<mosaic_0001>
module attributes {stable_mosaic.version = 11 : i64} {
  func.func @_fused_loss_kernel(%arg0: i32, %arg1: i32, %arg2: memref<2x4x256xbf16, #tpu.memory_space<vmem>>, %arg3: memref<8x4xbf16, #tpu.memory_space<vmem>>, %arg4: memref<8x1xf32, #tpu.memory_space<vmem>>, %arg5: memref<2x8x256xbf16, #tpu.memory_space<vmem>>, %arg6: memref<2x8x1xf32, #tpu.memory_space<vmem>>, %arg7: memref<1x1x1xf32, #tpu.memory_space<vmem>>, %arg8: memref<8x256xf32, #tpu.memory_space<vmem>>) attributes {dimension_semantics = [#tpu.dimension_semantics<parallel>, #tpu.dimension_semantics<arbitrary>], iteration_bounds = array<i64: 1, 1>, scalar_prefetch = 0 : i64, scratch_operands = 1 : i64, tpu.core_type = #tpu.core_type<tc>, window_params = [{transform_indices = @transform_0, window_bounds = array<i64: 2, 4, 256>}, {pipeline_mode = #tpu.pipeline_mode<synchronous>, transform_indices = @transform_1, window_bounds = array<i64: 8, 4>}, {pipeline_mode = #tpu.pipeline_mode<synchronous>, transform_indices = @transform_2, window_bounds = array<i64: 8, 1>}, {transform_indices = @transform_3, window_bounds = array<i64: 2, 8, 256>}, {transform_indices = @transform_4, window_bounds = array<i64: 2, 8, 1>}, {transform_indices = @transform_5, window_bounds = array<i64: 1, 1, 1>}]} {
    %c0_i32 = arith.constant 0 : i32
    %0 = arith.cmpi eq, %arg1, %c0_i32 : i32
    %1 = arith.extui %0 : i1 to i32
    %c0_i32_0 = arith.constant 0 : i32
    %2 = arith.cmpi ne, %1, %c0_i32_0 : i32
    scf.if %2 {
      %cst_34 = arith.constant 0.000000e+00 : f32
      %46 = vector.broadcast %cst_34 : f32 to vector<8x256xf32>
      %c0_35 = arith.constant 0 : index
      %c0_36 = arith.constant 0 : index
      %47 = vector.load %arg8[%c0_35, %c0_36] : memref<8x256xf32, #tpu.memory_space<vmem>>, vector<8x256xf32>
      tpu.vector_store %arg8[%c0_35, %c0_36], %46 {strides = array<i32>} : memref<8x256xf32, #tpu.memory_space<vmem>>, vector<8x256xf32>,
    } else {
    }
    %c0 = arith.constant 0 : index
    %c0_1 = arith.constant 0 : index
    %3 = vector.load %arg3[%c0, %c0_1] : memref<8x4xbf16, #tpu.memory_space<vmem>>, vector<8x4xbf16>
    %c0_2 = arith.constant 0 : index
    %c0_3 = arith.constant 0 : index
    %4 = vector.load %arg4[%c0_2, %c0_3] : memref<8x1xf32, #tpu.memory_space<vmem>>, vector<8x1xf32>
    %c0_4 = arith.constant 0 : index
    %c0_5 = arith.constant 0 : index
    %c0_6 = arith.constant 0 : index
    %5 = vector.load %arg2[%c0_4, %c0_5, %c0_6] : memref<2x4x256xbf16, #tpu.memory_space<vmem>>, vector<1x4x256xbf16>
    %6 = vector.shape_cast %5 : vector<1x4x256xbf16> to vector<4x256xbf16>
    %cst = arith.constant dense<0.000000e+00> : vector<8x256xf32>
    %7 = tpu.matmul %3, %6, %cst {dimension_numbers = #tpu.dot_dimension_numbers<[1], [0], [0], [1], [0, 0, 1, 1], [], []>} : vector<8x4xbf16>, vector<4x256xbf16>, vector<8x256xf32> -> vector<8x256xf32>
    %8 = vector.broadcast %4 : vector<8x1xf32> to vector<8x256xf32>
    %9 = arith.addf %7, %8 : vector<8x256xf32>
    %cst_7 = arith.constant 0.000000e+00 : f32
    %10 = vector.broadcast %cst_7 : f32 to vector<8x256xf32>
    %11 = arith.maximumf %9, %10 : vector<8x256xf32>
    %c0_8 = arith.constant 0 : index
    %c0_9 = arith.constant 0 : index
    %c0_10 = arith.constant 0 : index
    %12 = vector.load %arg5[%c0_8, %c0_9, %c0_10] : memref<2x8x256xbf16, #tpu.memory_space<vmem>>, vector<1x8x256xbf16>
    %13 = vector.shape_cast %12 : vector<1x8x256xbf16> to vector<8x256xbf16>
    %14 = arith.extf %13 : vector<8x256xbf16> to vector<8x256xf32>
    %15 = arith.subf %11, %14 : vector<8x256xf32>
    %c0_11 = arith.constant 0 : index
    %c0_12 = arith.constant 0 : index
    %16 = vector.load %arg8[%c0_11, %c0_12] : memref<8x256xf32, #tpu.memory_space<vmem>>, vector<8x256xf32>
    %c0_13 = arith.constant 0 : index
    %c0_14 = arith.constant 0 : index
    %c0_15 = arith.constant 0 : index
    %17 = vector.load %arg6[%c0_13, %c0_14, %c0_15] : memref<2x8x1xf32, #tpu.memory_space<vmem>>, vector<1x8x1xf32>
    %18 = vector.shape_cast %17 : vector<1x8x1xf32> to vector<8x1xf32>
    %19 = arith.mulf %15, %15 : vector<8x256xf32>
    %20 = vector.broadcast %18 : vector<8x1xf32> to vector<8x256xf32>
    %21 = arith.mulf %20, %19 : vector<8x256xf32>
    %22 = arith.addf %16, %21 : vector<8x256xf32>
    %c0_16 = arith.constant 0 : index
    %c0_17 = arith.constant 0 : index
    %23 = vector.load %arg8[%c0_16, %c0_17] : memref<8x256xf32, #tpu.memory_space<vmem>>, vector<8x256xf32>
    tpu.vector_store %arg8[%c0_16, %c0_17], %22 {strides = array<i32>} : memref<8x256xf32, #tpu.memory_space<vmem>>, vector<8x256xf32>,
    %c1 = arith.constant 1 : index
    %c0_18 = arith.constant 0 : index
    %c0_19 = arith.constant 0 : index
    %24 = vector.load %arg2[%c1, %c0_18, %c0_19] : memref<2x4x256xbf16, #tpu.memory_space<vmem>>, vector<1x4x256xbf16>
    %25 = vector.shape_cast %24 : vector<1x4x256xbf16> to vector<4x256xbf16>
    %cst_20 = arith.constant dense<0.000000e+00> : vector<8x256xf32>
    %26 = tpu.matmul %3, %25, %cst_20 {dimension_numbers = #tpu.dot_dimension_numbers<[1], [0], [0], [1], [0, 0, 1, 1], [], []>} : vector<8x4xbf16>, vector<4x256xbf16>, vector<8x256xf32> -> vector<8x256xf32>
    %27 = vector.broadcast %4 : vector<8x1xf32> to vector<8x256xf32>
    %28 = arith.addf %26, %27 : vector<8x256xf32>
    %cst_21 = arith.constant 0.000000e+00 : f32
    %29 = vector.broadcast %cst_21 : f32 to vector<8x256xf32>
    %30 = arith.maximumf %28, %29 : vector<8x256xf32>
    %c1_22 = arith.constant 1 : index
    %c0_23 = arith.constant 0 : index
    %c0_24 = arith.constant 0 : index
    %31 = vector.load %arg5[%c1_22, %c0_23, %c0_24] : memref<2x8x256xbf16, #tpu.memory_space<vmem>>, vector<1x8x256xbf16>
    %32 = vector.shape_cast %31 : vector<1x8x256xbf16> to vector<8x256xbf16>
    %33 = arith.extf %32 : vector<8x256xbf16> to vector<8x256xf32>
    %34 = arith.subf %30, %33 : vector<8x256xf32>
    %c0_25 = arith.constant 0 : index
    %c0_26 = arith.constant 0 : index
    %35 = vector.load %arg8[%c0_25, %c0_26] : memref<8x256xf32, #tpu.memory_space<vmem>>, vector<8x256xf32>
    %c1_27 = arith.constant 1 : index
    %c0_28 = arith.constant 0 : index
    %c0_29 = arith.constant 0 : index
    %36 = vector.load %arg6[%c1_27, %c0_28, %c0_29] : memref<2x8x1xf32, #tpu.memory_space<vmem>>, vector<1x8x1xf32>
    %37 = vector.shape_cast %36 : vector<1x8x1xf32> to vector<8x1xf32>
    %38 = arith.mulf %34, %34 : vector<8x256xf32>
    %39 = vector.broadcast %37 : vector<8x1xf32> to vector<8x256xf32>
    %40 = arith.mulf %39, %38 : vector<8x256xf32>
    %41 = arith.addf %35, %40 : vector<8x256xf32>
    %c0_30 = arith.constant 0 : index
    %c0_31 = arith.constant 0 : index
    %42 = vector.load %arg8[%c0_30, %c0_31] : memref<8x256xf32, #tpu.memory_space<vmem>>, vector<8x256xf32>
    tpu.vector_store %arg8[%c0_30, %c0_31], %41 {strides = array<i32>} : memref<8x256xf32, #tpu.memory_space<vmem>>, vector<8x256xf32>,
    %c0_i32_32 = arith.constant 0 : i32
    %43 = arith.cmpi eq, %arg1, %c0_i32_32 : i32
    %44 = arith.extui %43 : i1 to i32
    %c0_i32_33 = arith.constant 0 : i32
    %45 = arith.cmpi ne, %44, %c0_i32_33 : i32
    scf.if %45 {
      %c0_34 = arith.constant 0 : index
      %c0_35 = arith.constant 0 : index
      %46 = vector.load %arg8[%c0_34, %c0_35] : memref<8x256xf32, #tpu.memory_space<vmem>>, vector<8x256xf32>
      %47 = vector.shape_cast %46 : vector<8x256xf32> to vector<1x8x256xf32>
      %cst_36 = arith.constant dense<0.000000e+00> : vector<1xf32>
      %48 = vector.multi_reduction <add>, %47, %cst_36 [1, 2] : vector<1x8x256xf32> to vector<1xf32>
      %49 = vector.shape_cast %48 : vector<1xf32> to vector<1x1x1xf32>
      %50 = vector.extract %49[0, 0, 0] : f32 from vector<1x1x1xf32>
      %51 = vector.broadcast %50 : f32 to vector<1x1xf32>
      %c0_37 = arith.constant 0 : index
      %c0_38 = arith.constant 0 : index
      %c0_39 = arith.constant 0 : index
      %52 = vector.load %arg7[%c0_37, %c0_38, %c0_39] : memref<1x1x1xf32, #tpu.memory_space<vmem>>, vector<1x1x1xf32>
      %53 = vector.shape_cast %52 : vector<1x1x1xf32> to vector<1x1xf32>
      %54 = vector.shape_cast %51 : vector<1x1xf32> to vector<1x1x1xf32>
      tpu.vector_store %arg7[%c0_37, %c0_38, %c0_39], %54 {strides = array<i32>} : memref<1x1x1xf32, #tpu.memory_space<vmem>>, vector<1x1x1xf32>,
    } else {
    }
    return
  }
  func.func @transform_0(%arg0: i32, %arg1: i32) -> (i32, i32, i32) {
    %c0_i32 = arith.constant 0 : i32
    %c0_i32_0 = arith.constant 0 : i32
    return %arg0, %c0_i32, %arg1 : i32, i32, i32
  }
  func.func @transform_1(%arg0: i32, %arg1: i32) -> (i32, i32) {
    %c0_i32 = arith.constant 0 : i32
    %c0_i32_0 = arith.constant 0 : i32
    %c0_i32_1 = arith.constant 0 : i32
    return %c0_i32, %c0_i32_0 : i32, i32
  }
  func.func @transform_2(%arg0: i32, %arg1: i32) -> (i32, i32) {
    %c0_i32 = arith.constant 0 : i32
    %c0_i32_0 = arith.constant 0 : i32
    %c0_i32_1 = arith.constant 0 : i32
    return %c0_i32, %c0_i32_0 : i32, i32
  }
  func.func @transform_3(%arg0: i32, %arg1: i32) -> (i32, i32, i32) {
    %c0_i32 = arith.constant 0 : i32
    %c0_i32_0 = arith.constant 0 : i32
    return %arg0, %c0_i32, %arg1 : i32, i32, i32
  }
  func.func @transform_4(%arg0: i32, %arg1: i32) -> (i32, i32, i32) {
    %c0_i32 = arith.constant 0 : i32
    %c0_i32_0 = arith.constant 0 : i32
    %c0_i32_1 = arith.constant 0 : i32
    return %arg0, %c0_i32, %c0_i32_0 : i32, i32, i32
  }
  func.func @transform_5(%arg0: i32, %arg1: i32) -> (i32, i32, i32) {
    %c0_i32 = arith.constant 0 : i32
    %c0_i32_0 = arith.constant 0 : i32
    %c0_i32_1 = arith.constant 0 : i32
    return %arg0, %c0_i32, %c0_i32_0 : i32, i32, i32
  }
}

</mosaic_0001>

<bundles_post_ra>
// kernel: tpu_custom_call.1
= control target key start
LH: loop header
LB: loop body
LE: loop exit
PB: predicated region body
PF: predicated region fallthrough
CT: control target
= control target key end

     0   :  { %vm49_vm0 = vcmask 1041408   ;;  %v274_v4 = vmov 0   ;;  %s346_s0 = inlined_call_operand.vmem [shape: bf16[2,4,256], index: 0, kind: input, shape index: {}]   ;;  %s347_s1 = inlined_call_operand.vmem [shape: bf16[8,4], index: 1, kind: input, shape index: {}]   ;;  %s348_s2 = inlined_call_operand.vmem [shape: f32[8,1], index: 2, kind: input, shape index: {}]   ;;  %s349_s3 = inlined_call_operand.vmem [shape: bf16[2,8,256], index: 3, kind: input, shape index: {}]   ;;  %s350_s4 = inlined_call_operand.vmem [shape: f32[2,8,1], index: 4, kind: input, shape index: {}]   ;;  %s351_s5 = inlined_call_operand.hbm [shape: f32[1,1,1], index: 5, kind: output, shape index: {}]  }
   0x1   :  { %v235_v0 = vld.sshfl [vmem:[%s346_s0] sm:$0x33 pattern:$0x76325410]  ;;  %88 = vmatprep.mubr.bf16.mxu0 %v274_v4  ;;  %169 = vmatprep.mubr.bf16.mxu1 %v274_v4  ;;  %v243_v8 = vld [vmem:[%s350_s4 + $0x8] sm:$0xff] }
   0x2   :  { %v44_v1 = vcombine.high %v235_v0, %v235_v0  ;;  %v239_v2 = vld.sshfl [vmem:[%s346_s0 + $0x4] sm:$0x33 pattern:$0x76325410]  ;;  %v51_v3 = vsel %vm49_vm0, %v235_v0, 0  ;;  %248 = vset.pattern.permute.xlu0 %v274_v4  ;;  %249 = vset.pattern.permute.xlu1 %v274_v4 }
   0x3   :  { %v130_v5 = vcombine.high %v239_v2, %v239_v2  ;;  %v132_v6 = vsel %vm49_vm0, %v239_v2, 0  ;;  %v29_v7 = vld [vmem:[%s348_s2] sm:$0xff] }
   0x4   :  { %236 = vmatprep.subr.msk.bf16.mxu0 %vm49_vm0, %v44_v1  ;;  %33 = vperm.xlu0 %248, %v29_v7  }
   0x5   :  { %10 = vsyncpa [#allocation4], 0  ;;  %240 = vmatprep.subr.msk.bf16.mxu1 %vm49_vm0, %v130_v5  ;;  %57 = vmatpush1.bf16.msra.mxu0 %v51_v3  ;;  %v28_v9 = vld [vmem:[%s347_s1] sm:$0xf]  ;;  %vm45_vm1 = vcmask 31744   ;;  %v242_v12 = vld [vmem:[%s349_s3 + $0x8] sm:$0xff] }
   0x6   :  { %v106_v10 = vld [vmem:[%s350_s4] sm:$0xff]  ;;  %138 = vmatpush1.bf16.msra.mxu1 %v132_v6  ;;  %194 = vperm.xlu1 %249, %v243_v8   ;;  %v182_v20 = vunpack.c.l.bf16 %v242_v12  ;;  %v183_v27 = vunpack.c.h.bf16 %v242_v12  ;;  %s275_s1 = smov [#allocation3]   ;;  %vm219_vm2 = vcmask 0  }
   0x7   :  { %v99_v11 = vld [vmem:[%s349_s3] sm:$0xff]  ;;  %s227_s3 = sshll.u32 %s275_s1, 4  ;;  %s228_s3 = int_to_ptr.vmem [resolvable:$true] %s227_s3 }
   0x8   :  { %237 = vmatmul.mubr.msk.bf16.vlgmr.msra.gmra.mrb[0].mxu0 %vm45_vm1, %v28_v9  ;;  %111 = vperm.xlu0 %248, %v106_v10   ;;  %v100_v17 = vunpack.c.l.bf16 %v99_v11  ;;  %v101_v22 = vunpack.c.h.bf16 %v99_v11  ;;  %s250_s7 = scalar_lea.vmem %s228_s3, 16  ;;  %s254_s8 = scalar_lea.vmem %s228_s3, 32 }
   0x9   :  { %241 = vmatmul.mubr.msk.bf16.vlgmr.msra.gmra.mrb[0].mxu1 %vm45_vm1, %v28_v9  ;;  %p251_p0 = scmp.ne.s32.totalorder %s228_s3, %s250_s7  ;;  %p255_p1 = scmp.lt.s32.totalorder %s228_s3, %s228_s3 }
   0xa   :  { %p256_p2 = scmp.lt.s32.totalorder %s254_s8, %s250_s7 }
   0xc   :  { %p257_p3 = por %p256_p2, %p255_p1 }
   0xe   :  { %p258_p4 = pnand %p257_p3, %p251_p0 }
  0x83   :  { %v34_v13 = vpop.permute.xlu0 %33 }
  0x85   :  { %v195_v39 = vpop.permute.xlu1 %194 }
  0x87   :  { %v112_v41 = vpop.permute.xlu0 %111 }
  0xdb   :  { %v90_v14 = vpop.f32.mrb[0].mxu0 }
  0xdc   :  { %v91_v15 = vadd.f32 %v90_v14, %v34_v13  ;;  %v171_v16 = vpop.f32.mrb[0].mxu1  ;;  %v92_v18 = vpop.f32.mrb[1].mxu0 }
  0xdd   :  { %v172_v19 = vadd.f32 %v171_v16, %v34_v13  ;;  %v93_v21 = vadd.f32 %v92_v18, %v34_v13  ;;  %v173_v23 = vpop.f32.mrb[1].mxu1  ;;  %v94_v24 = vpop.f32.mrb[2].mxu0 }
  0xde   :  { %v97_v25 = vmax.f32 %v91_v15, 0.0  ;;  %v174_v26 = vadd.f32 %v173_v23, %v34_v13  ;;  %v175_v28 = vpop.f32.mrb[2].mxu1  ;;  %v95_v29 = vpop.f32.mrb[3].mxu0 }
  0xdf   :  { %v178_v30 = vmax.f32 %v172_v19, 0.0  ;;  %v98_v31 = vmax.f32 %v93_v21, 0.0  ;;  %v176_v32 = vpop.f32.mrb[3].mxu1 }
  0xe0   :  { %v102_v33 = vsub.f32 %v97_v25, %v100_v17  ;;  %v179_v34 = vmax.f32 %v174_v26, 0.0 }
  0xe1   :  { %v184_v35 = vsub.f32 %v178_v30, %v182_v20  ;;  %v103_v36 = vsub.f32 %v98_v31, %v101_v22 }
  0xe2   :  { %v107_v37 = vmul.f32 %v102_v33, %v102_v33  ;;  %v185_v38 = vsub.f32 %v179_v34, %v183_v27 }
  0xe3   :  { %v190_v40 = vmul.f32 %v184_v35, %v184_v35  ;;  %v108_v42 = vmul.f32 %v103_v36, %v103_v36 }
  0xe4   :  { %v114_v43 = vmul.f32 %v112_v41, %v107_v37  ;;  %v191_v44 = vmul.f32 %v185_v38, %v185_v38 }
  0xe5   :  { %v197_v45 = vmul.f32 %v195_v39, %v190_v40  ;;  %v115_v46 = vmul.f32 %v112_v41, %v108_v42 }
  0xe6   :  { %v198_v47 = vmul.f32 %v195_v39, %v191_v44 }
  0xe7   :  { %v199_v48 = vadd.f32 %v197_v45, %v114_v43 }
  0xe8   :  { %v200_v49 = vadd.f32 %v198_v47, %v115_v46 }
  0xea   :  { %v208_v50 = vadd.f32 %v200_v49, %v199_v48 }
  0xec   :  { %209 = vadd.xlane.f32.xlu1 %v208_v50 }
 0x179   :  { %v210_v51 = vpop.xlane.xlu1 %209 }
 0x17a   :  { %v211_v52 = vrot.slane %v210_v51, 4 }
 0x17c   :  { %v212_v53 = vadd.f32 %v211_v52, %v210_v51 }
 0x17e   :  { %v213_v54 = vrot.slane %v212_v53, 2 }
 0x180   :  { %v214_v55 = vadd.f32 %v213_v54, %v212_v53 }
 0x182   :  { %v215_v56 = vrot.slane %v214_v55, 1 }
 0x184   :  { %v216_v57 = vadd.f32 %v215_v56, %v214_v55 }
 0x186   :  { %244 = vpush %v216_v57 }
 0x1b7   :  { %s245_s4 = spop %244 }
 0x1b8   :  { %v218_v58 = vstv %s245_s4 }
 0x1b9   :  { %220 = vst.msk [vmem:[#allocation3] sm:$0x1] %vm219_vm2, %v218_v58 }
 0x1ba   :  { %261 = shalt.err (!%p258_p4)
}
 0x1bb   :  { %s262_s11 = scalar_lea.hbm %s351_s5, 16 }
 0x1bc   :  { %p263_p5 = scmp.ne.s32.totalorder %s351_s5, %s262_s11  ;;  %p266_p6 = scmp.lt.u32.totalorder %s262_s11, %s351_s5 }
 0x1be   :  { %p268_p7 = pnand %p266_p6, %p263_p5 }
 0x1c0   :  { %271 = shalt.err (!%p268_p7)
}
 0x1c1   :  { %230 = dma.vmem_to_hbm [thread:$0]  %s228_s3, 16, %s351_s5, [#allocation4]  }
 0x1c2   :  { %272 = dma.done.wait [#allocation4], 16  }
 0x1c3   :  { %273 = vsyncadd [#allocation4], 4294967280 }
 0x1c4   :  { %234 = vsyncpa [#allocation4], 1 }

</bundles_post_ra>
